<compile_context>
chip_gen: v5e
topology: v5e:2x2
jax: 0.10.0
libtpu: 0.0.40
codegen_flags: <defaults>
</compile_context>

<pallas_src>
import functools
import math
import numpy as np
import jax
import jax.numpy as jnp
from jax.experimental import pallas as pl
from jax.experimental.pallas import tpu as pltpu

K_PERIODS = 2      # self.k
PATCH_K = 4        # self.patch_k
NUM_HEADS = 8
DTYPE = jnp.float32

_VMEM = pl.BlockSpec(memory_space=pltpu.MemorySpace.VMEM)
_SMEM = pl.BlockSpec(memory_space=pltpu.MemorySpace.SMEM)


# ---------------------------------------------------------------------------
# Kernel 1: FFT_for_Period amplitude spectrum
#   abs(rfft(x, dim=1)).mean(0).mean(-1) == mean_{b,n} |DFT_t x[b,t,n]|
# Single matmul against a fused cos|sin basis (DC column zeroed, freq dim
# lane-padded to 128), amplitude + row mean in-kernel.
# ---------------------------------------------------------------------------
def _fft_amp_kernel(x_ref, basis_ref, o_ref):
    fp = o_ref.shape[-1]
    out = jnp.dot(x_ref[...], basis_ref[...],
                  preferred_element_type=jnp.float32)          # (BN, 2*Fp)
    re = out[:, :fp]
    im = out[:, fp:]
    amp = jnp.sqrt(re * re + im * im)
    o_ref[...] = jnp.mean(amp, axis=0, keepdims=True)          # (1, Fp)


def fft_mean_amplitude(x):
    """x: (B, T, N) -> (Fr,) mean amplitude over batch & channels (f32)."""
    B, T, N = x.shape
    Fr = T // 2 + 1
    Fp = ((Fr + 127) // 128) * 128                             # lane-dense pad
    t = np.arange(T)[:, None].astype(np.float64)
    f = np.arange(Fp)[None, :].astype(np.float64)
    ang = 2.0 * np.pi * t * f / T
    valid = ((np.arange(Fp) > 0) & (np.arange(Fp) < Fr)).astype(np.float64)[None, :]
    cos_m = np.cos(ang) * valid                                # DC + padding zeroed
    sin_m = np.sin(ang) * valid
    basis = jnp.asarray(np.concatenate([cos_m, sin_m], axis=1), DTYPE)   # (T, 2*Fp)
    x2 = jnp.transpose(x, (0, 2, 1)).reshape(B * N, T)         # rows on sublanes
    out = pl.pallas_call(
        _fft_amp_kernel,
        out_shape=jax.ShapeDtypeStruct((1, Fp), jnp.float32),
        in_specs=[_VMEM, _VMEM],
        out_specs=_VMEM,
    )(x2, basis)
    return out[0, :Fr]


# ---------------------------------------------------------------------------
# Kernel 2: fused TimesNet body, single program.
# Both period branches in one score matmul (block-diag xp, stacked Ws),
# one grouped softmax (group-sum denominator matmul), probabilities combined
# with the softmaxed branch weights, then ONE value/output matmul.
# ---------------------------------------------------------------------------
def _timesnet_fused_kernel(xp_ref, w_ref, sbias_ref, gmat_ref, vw_ref, bo_ref,
                           wsoft_ref, o_ref, *, bn):
    # scores of BOTH branches and ALL heads in one matmul: (2*BN, NH*S)
    s = jnp.dot(xp_ref[...].astype(jnp.bfloat16), w_ref[...],
                preferred_element_type=jnp.float32) + sbias_ref[...]
    # per-row offset is exact for grouped softmax
    s = s - jnp.max(s, axis=-1, keepdims=True)
    p = jnp.exp(s)
    # per-head softmax denominators broadcast to every lane of the head
    denom = jnp.dot(p.astype(jnp.bfloat16), gmat_ref[...],
                    preferred_element_type=jnp.float32)
    p = p * pl.reciprocal(jnp.maximum(denom, 1e-20), approx=True)
    # combine the two branches on the probabilities (matmul is linear,
    # wsoft sums to 1) -> single value/output matmul for both branches
    p_comb = wsoft_ref[0] * p[:bn, :] + wsoft_ref[1] * p[bn:, :]   # (BN, NH*S)
    out = jnp.dot(p_comb.astype(jnp.bfloat16), vw_ref[...],
                  preferred_element_type=jnp.float32) + bo_ref[...]  # (BN, Hp)
    # TODO(synk): GPT-2 backbone (AccustumGPT2Model + LoRA/PEFT) has no clean
    # Pallas equivalent; it is treated as identity on inputs_embeds.
    o_ref[...] = out.astype(o_ref.dtype)


def timesnet_fused(xp_cat, w_cat, sbias, gmat, vw_pad, bo_pad, wsoft, bn):
    hp = vw_pad.shape[-1]
    return pl.pallas_call(
        functools.partial(_timesnet_fused_kernel, bn=bn),
        out_shape=jax.ShapeDtypeStruct((bn, hp), DTYPE),
        in_specs=[_VMEM] * 6 + [_SMEM],
        out_specs=_VMEM,
    )(xp_cat, w_cat, sbias, gmat, vw_pad, bo_pad, wsoft)


# ---------------------------------------------------------------------------
# Glue: period reshaping (pure index shuffling, no compute) — matches torch.
# ---------------------------------------------------------------------------
def reshape_to_patches(x, period, seq_len, patch_k):
    B, T, N = x.shape
    if seq_len % period != 0:
        length = (seq_len // period + 1) * period
        pad = jnp.zeros((B, length - seq_len, N), x.dtype)
        out = jnp.concatenate([x, pad], axis=1)
    else:
        length = seq_len
        out = x
    out = out.reshape(B, length // period, period, N)
    out = jnp.transpose(out, (0, 3, 1, 2))                     # (B, N, F, P)
    _, _, Fd, P = out.shape
    pad_len = (patch_k - P % patch_k) % patch_k
    if pad_len > 0:
        out = jnp.concatenate(
            [out, jnp.zeros((B, N, Fd, pad_len), out.dtype)], axis=-1)
    P = P + pad_len
    out = out.reshape(B, N, Fd, P // patch_k, patch_k)
    out = jnp.transpose(out, (0, 1, 3, 2, 4))                  # (B, N, P/pk, F, pk)
    out = out.reshape(B, N, (P * Fd) // patch_k, patch_k)      # (B, N, time_dim, pk)
    return out


# ---------------------------------------------------------------------------
# Full forward
# ---------------------------------------------------------------------------
def timesnet_forward(x, word_embedding_t, mha_params, rng_key):
    B, T, N = x.shape
    S, hidden = word_embedding_t.shape
    head_dim = hidden // NUM_HEADS
    hs = NUM_HEADS * S
    hp = ((hidden + 127) // 128) * 128
    scale = 1.0 / math.sqrt(head_dim)
    BN = B * N

    # NOTE: self.conv (Inception_Block_V1 -> GELU -> Inception_Block_V1) is
    # instantiated in the torch forward but never applied, so it is omitted.

    wq_t, wk_t, wv_t, wo_t, bq, bk, bv, bo = mha_params        # (H,H) / (1,H)

    # --- FFT amplitude kernel dispatched first (overlaps constant prep) -----
    freq = fft_mean_amplitude(x)                               # (Fr,), DC already 0

    # --- period-independent constant prep, BEFORE the host sync -------------
    k_mat = jnp.dot(word_embedding_t, wk_t) + bk               # (S, H)
    v_mat = jnp.dot(word_embedding_t, wv_t) + bv               # (S, H)
    head_mask = jnp.asarray(
        ((np.arange(hidden)[:, None] // head_dim) ==
         (np.arange(hs)[None, :] // S)).astype(np.float32))    # (H, NH*S)
    # block-diagonal packing: k_bd[h*hd+d, h*S+s] = K[s, h*hd+d]; same for V.
    k_bd = jnp.tile(k_mat.T, (1, NUM_HEADS)) * head_mask       # (H, NH*S) f32
    v_bd = jnp.tile(v_mat, (NUM_HEADS, 1)) * head_mask.T       # (NH*S, H) f32
    gmat = jnp.asarray(((np.arange(hs)[:, None] // S) ==
                        (np.arange(hs)[None, :] // S)).astype(np.float32),
                       jnp.bfloat16)                           # per-head group sum
    # fold Wq + scale into the score path; fold Wo into the value path
    a_mat = jnp.dot(wq_t, k_bd) * scale                        # (H, NH*S)
    bqk = jnp.dot(bq, k_bd) * scale                            # (1, NH*S)
    vw = jnp.dot(v_bd, wo_t)                                   # (NH*S, H)
    vw_pad = jnp.pad(vw, ((0, 0), (0, hp - hidden))).astype(jnp.bfloat16)
    bo_pad = jnp.pad(bo, ((0, 0), (0, hp - hidden))).astype(DTYPE)
    # random per-forward combine weights, softmaxed (as in the torch module)
    w_raw = jax.random.normal(jax.random.fold_in(rng_key, 12345), (K_PERIODS,), DTYPE)
    wsoft = jax.nn.softmax(w_raw).astype(DTYPE)

    # --- top-k: only k integer indices cross to host (static reshape shapes,
    #     exactly as torch's .detach().cpu().numpy()) ------------------------
    _, top_idx_dev = jax.lax.top_k(freq, K_PERIODS)
    top_idx = np.asarray(jax.device_get(top_idx_dev))
    top_idx = np.maximum(top_idx, 1)                           # guard all-zero spectrum
    periods = (T // top_idx).astype(np.int64)

    # --- per-branch patching + fully folded score weights --------------------
    xps, ws, bss = [], [], []
    for i in range(K_PERIODS):
        period = int(periods[i])
        patches = reshape_to_patches(x, period, T, PATCH_K)    # (B, N, TD, PK)
        td = patches.shape[2]
        xps.append(patches.reshape(BN, td * PATCH_K))
        kw, kb = jax.random.split(jax.random.fold_in(rng_key, i))
        w_lin = 0.02 * jax.random.normal(kw, (hidden, td), DTYPE)
        b_lin = 0.02 * jax.random.normal(kb, (1, hidden), DTYPE)
        # fold patch mean-pool into the weight, then fold Wq/scale/K_bd too
        w_fold = jnp.repeat(jnp.transpose(w_lin), PATCH_K, axis=0) / PATCH_K
        ws.append(jnp.dot(w_fold, a_mat))                      # (td*PK, NH*S)
        bss.append(jnp.dot(b_lin, a_mat) + bqk)                # (1, NH*S)

    k0, k1 = xps[0].shape[1], xps[1].shape[1]
    # block-diagonal activation slab + stacked weights -> ONE score matmul
    xp_cat = jnp.concatenate(
        [jnp.concatenate([xps[0], jnp.zeros((BN, k1), DTYPE)], axis=1),
         jnp.concatenate([jnp.zeros((BN, k0), DTYPE), xps[1]], axis=1)], axis=0)
    w_cat = jnp.concatenate(ws, axis=0).astype(jnp.bfloat16)   # (k0+k1, NH*S)
    sbias = jnp.concatenate([jnp.broadcast_to(bss[0], (BN, hs)),
                             jnp.broadcast_to(bss[1], (BN, hs))], axis=0)

    out = timesnet_fused(xp_cat, w_cat, sbias, gmat, vw_pad, bo_pad, wsoft, BN)
    return out[:, :hidden].reshape(B, N, hidden)


if __name__ == "__main__":
    key = jax.random.PRNGKey(0)
    B, T, N = 2, 16, 4          # batch, seq_len, num variables
    HIDDEN = 32                 # hidden_dim of the word embedding / attention
    VOCAB = 16                  # number of word-embedding tokens (S)

    k_x, k_we, k_win, k_bin, k_wo, k_bo, k_misc = jax.random.split(key, 7)
    x = jax.random.normal(k_x, (B, T, N), DTYPE)
    word_embedding_t = 0.02 * jax.random.normal(k_we, (VOCAB, HIDDEN), DTYPE)

    # MultiheadAttention parameters: in_proj (3H, H) + bias, out_proj (H, H) + bias
    w_in = 0.02 * jax.random.normal(k_win, (3 * HIDDEN, HIDDEN), DTYPE)
    b_in = 0.02 * jax.random.normal(k_bin, (3 * HIDDEN,), DTYPE)
    w_out = 0.02 * jax.random.normal(k_wo, (HIDDEN, HIDDEN), DTYPE)
    b_out = 0.02 * jax.random.normal(k_bo, (HIDDEN,), DTYPE)
    mha_params = (
        jnp.transpose(w_in[:HIDDEN]),                 # Wq^T  (H, H)
        jnp.transpose(w_in[HIDDEN:2 * HIDDEN]),       # Wk^T
        jnp.transpose(w_in[2 * HIDDEN:]),             # Wv^T
        jnp.transpose(w_out),                         # Wo^T
        b_in[:HIDDEN].reshape(1, HIDDEN),
        b_in[HIDDEN:2 * HIDDEN].reshape(1, HIDDEN),
        b_in[2 * HIDDEN:].reshape(1, HIDDEN),
        b_out.reshape(1, HIDDEN),
    )

    out = timesnet_forward(x, word_embedding_t, mha_params, k_misc)
    out = jax.block_until_ready(out)
    assert out.shape == (B, N, HIDDEN), out.shape
    assert bool(jnp.all(jnp.isfinite(out)))
    print("KERNEL_OK")
</pallas_src>

<mosaic_0001>
module attributes {stable_mosaic.version = 11 : i64} {
  func.func @_fft_amp_kernel(%arg0: memref<8x16xf32, #tpu.memory_space<vmem>>, %arg1: memref<16x256xf32, #tpu.memory_space<vmem>>, %arg2: memref<1x128xf32, #tpu.memory_space<vmem>>) attributes {dimension_semantics = [], scalar_prefetch = 0 : i64, scratch_operands = 0 : i64, tpu.core_type = #tpu.core_type<tc>} {
    %c0 = arith.constant 0 : index
    %c0_0 = arith.constant 0 : index
    %0 = vector.load %arg0[%c0, %c0_0] : memref<8x16xf32, #tpu.memory_space<vmem>>, vector<8x16xf32>
    %c0_1 = arith.constant 0 : index
    %c0_2 = arith.constant 0 : index
    %1 = vector.load %arg1[%c0_1, %c0_2] : memref<16x256xf32, #tpu.memory_space<vmem>>, vector<16x256xf32>
    %cst = arith.constant dense<0.000000e+00> : vector<8x256xf32>
    %2 = tpu.matmul %0, %1, %cst {dimension_numbers = #tpu.dot_dimension_numbers<[1], [0], [0], [1], [0, 0, 1, 1], [], []>} : vector<8x16xf32>, vector<16x256xf32>, vector<8x256xf32> -> vector<8x256xf32>
    %3 = vector.extract_strided_slice %2 {offsets = [0, 0], sizes = [8, 128], strides = [1, 1]} : vector<8x256xf32> to vector<8x128xf32>
    %4 = vector.extract_strided_slice %2 {offsets = [0, 128], sizes = [8, 128], strides = [1, 1]} : vector<8x256xf32> to vector<8x128xf32>
    %5 = arith.mulf %3, %3 : vector<8x128xf32>
    %6 = arith.mulf %4, %4 : vector<8x128xf32>
    %7 = arith.addf %5, %6 : vector<8x128xf32>
    %8 = math.sqrt %7 : vector<8x128xf32>
    %cst_3 = arith.constant dense<0.000000e+00> : vector<128xf32>
    %9 = vector.multi_reduction <add>, %8, %cst_3 [0] : vector<8x128xf32> to vector<128xf32>
    %10 = vector.shape_cast %9 : vector<128xf32> to vector<1x128xf32>
    %cst_4 = arith.constant 8.000000e+00 : f32
    %11 = vector.broadcast %cst_4 : f32 to vector<1x128xf32>
    %12 = arith.divf %10, %11 : vector<1x128xf32>
    %c0_5 = arith.constant 0 : index
    %c0_6 = arith.constant 0 : index
    %13 = vector.load %arg2[%c0_5, %c0_6] : memref<1x128xf32, #tpu.memory_space<vmem>>, vector<1x128xf32>
    tpu.vector_store %arg2[%c0_5, %c0_6], %12 {strides = array<i32>} : memref<1x128xf32, #tpu.memory_space<vmem>>, vector<1x128xf32>,
    return
  }
}

</mosaic_0001>

<bundles_post_ra>
// kernel: tpu_custom_call.1
= control target key start
LH: loop header
LB: loop body
LE: loop exit
PB: predicated region body
PF: predicated region fallthrough
CT: control target
= control target key end

     0   :  { %7 = vsyncpa [#allocation3], 0  ;;  %s259_s0 = inlined_call_operand.hbm [shape: f32[8,16], index: 0, kind: input, shape index: {}]   ;;  %s260_s1 = inlined_call_operand.hbm [shape: f32[16,256], index: 1, kind: input, shape index: {}]   ;;  %s261_s2 = inlined_call_operand.hbm [shape: f32[1,128], index: 2, kind: output, shape index: {}]  }
   0x1   :  { %8 = vsyncpa [#allocation6], 0 }
   0x2   :  { %9 = vsyncpa [#allocation4], 0  ;;  %s15_s11 = sshll.u32 %s259_s0, 4  ;;  %s229_s12 = smov [#allocation2]   ;;  %s16_s11 = int_to_ptr.hbm [resolvable:$true] %s15_s11 }
   0x3   :  { %s17_s13 = sshll.u32 %s229_s12, 4  ;;  %s25_s16 = sshll.u32 %s260_s1, 4  ;;  %s18_s13 = int_to_ptr.vmem [resolvable:$true] %s17_s13  ;;  %s26_s16 = int_to_ptr.hbm [resolvable:$true] %s25_s16 }
   0x4   :  { %20 = dma.hbm_to_vmem [thread:$0]  %s16_s11, 128, %s18_s13, [#allocation3]  }
   0x5   :  { %s230_s17 = smov [#allocation5]   ;;  %s231_s19 = smov 256  }
   0x6   :  { %s27_s18 = sshll.u32 %s230_s17, 4  ;;  %s232_s20 = smov 16   ;;  %s28_s18 = int_to_ptr.vmem [resolvable:$true] %s27_s18 }
   0x7   :  { %33 = dma.hbm_to_vmem [thread:$0]  %s26_s16, 512, %s28_s18, [#allocation6], %s231_s19, %s231_s19, %s232_s20  }
   0x8   :  { %223 = dma.done.wait [#allocation3], 128  }
   0x9   :  { %224 = vsyncadd [#allocation3], 4294967168 }
   0xa   :  { %225 = dma.done.wait [#allocation6], 512  }
   0xb   :  { %226 = vsyncadd [#allocation6], 4294966784  ;;  %v45_v0 = vld [vmem:[#allocation5 + $0x10] sm:$0xff]  ;;  %v46_v1 = vld [vmem:[#allocation5 + $0x18] sm:$0xff]  ;;  %vm47_vm0 = vcmask 130048   ;;  %v233_v10 = vmov 8.0  }
   0xc   :  { %v43_v2 = vld [vmem:[#allocation5] sm:$0xff]  ;;  %65 = vmatpush.msra.mxu0 %v45_v0  ;;  %85 = vmatpush.msra.mxu1 %v46_v1  ;;  %v44_v3 = vld [vmem:[#allocation5 + $0x8] sm:$0xff]  ;;  %v42_v4 = vld [vmem:[#allocation2] sm:$0xff]  ;;  %s234_s0 = smov [#allocation7]   ;;  %s128_s23 = sshll.u32 %s261_s2, 4  ;;  %s129_s23 = int_to_ptr.hbm [resolvable:$true] %s128_s23 }
   0xd   :  { %s126_s1 = sshll.u32 %s234_s0, 4  ;;  %s127_s1 = int_to_ptr.vmem [resolvable:$true] %s126_s1 }
   0xe   :  { %66 = vmatpush.msra.mxu0 %v43_v2  ;;  %86 = vmatpush.msra.mxu1 %v44_v3 }
   0xf   :  { %139 = vmatmul.msk.f32.vlgmr.msra.gmra.mxu0 %vm47_vm0, %v42_v4  ;;  %140 = vmatmul.msk.f32.vlgmr.msra.gmra.mxu1 %vm47_vm0, %v42_v4 }
  0x8c   :  { %v68_v5 = vpop.f32.mrf.mxu0  ;;  %v88_v6 = vpop.f32.mrf.mxu1 }
  0x8d   :  { %v91_v7 = vmul.f32 %v68_v5, %v68_v5  ;;  %v92_v8 = vmul.f32 %v88_v6, %v88_v6 }
  0x8f   :  { %v93_v9 = vadd.f32 %v92_v8, %v91_v7 }
  0x91   :  { %147 = vrsqrt.f32 %v93_v9  ;;  %vm101_vm1 = vcmp.eq.f32.partialorder %v93_v9, inf  ;;  %v104_v20 = vand.u32 2147483648, %v93_v9  ;;  %vm103_vm2 = vcmp.eq.f32.partialorder %v93_v9, 0.0 }
  0x92   :  { %149 = vrcp.f32 %v233_v10 }
  0x97   :  { %v148_v11 = vpop.eup %147 }
  0x98   :  { %v95_v12 = vmul.f32 %v148_v11, %v93_v9  ;;  %v150_v14 = vpop.eup %149 }
  0x99   :  { %v113_v17 = vmul.f32 8.0, %v150_v14  ;;  %vm117_vm3 = vweird.f32 %v150_v14 }
  0x9a   :  { %v96_v13 = vmul.f32 %v148_v11, %v95_v12 }
  0x9b   :  { %v114_v21 = vsub.f32 1.0, %v113_v17 }
  0x9c   :  { %v97_v15 = vmul.f32 0.5, %v96_v13 }
  0x9d   :  { %v115_v25 = vmul.f32 %v150_v14, %v114_v21 }
  0x9e   :  { %v98_v16 = vsub.f32 1.5, %v97_v15 }
  0x9f   :  { %v116_v28 = vadd.f32 %v150_v14, %v115_v25 }
  0xa0   :  { %v99_v18 = vmul.f32 %v148_v11, %v98_v16 }
  0xa1   :  { %v118_v31 = vsel %vm117_vm3, %v150_v14, %v116_v28 }
  0xa2   :  { %v100_v19 = vmul.f32 %v99_v18, %v93_v9 }
  0xa4   :  { %v102_v22 = vsel %vm101_vm1, %v93_v9, %v100_v19 }
  0xa5   :  { %v105_v23 = vsel %vm103_vm2, %v104_v20, %v102_v22 }
  0xa6   :  { %v106_v24 = vrot.slane %v105_v23, 4 }
  0xa8   :  { %v107_v26 = vadd.f32 %v106_v24, %v105_v23 }
  0xaa   :  { %v108_v27 = vrot.slane %v107_v26, 2 }
  0xac   :  { %v109_v29 = vadd.f32 %v108_v27, %v107_v26 }
  0xae   :  { %v110_v30 = vrot.slane %v109_v29, 1 }
  0xb0   :  { %v111_v32 = vadd.f32 %v110_v30, %v109_v29 }
  0xb2   :  { %v119_v33 = vmul.f32 %v118_v31, %v111_v32 }
  0xb4   :  { %120 = vst [vmem:[#allocation7] sm:$0x1] %v119_v33 }
  0xb5   :  { %131 = dma.vmem_to_hbm [thread:$0]  %s127_s1, 16, %s129_s23, [#allocation4]  }
  0xb6   :  { %227 = dma.done.wait [#allocation4], 16  }
  0xb7   :  { %228 = vsyncadd [#allocation4], 4294967280 }
  0xb8   :  { %136 = vsyncpa [#allocation3], 1 }
  0xb9   :  { %137 = vsyncpa [#allocation6], 1 }
  0xba   :  { %138 = vsyncpa [#allocation4], 1 }

</bundles_post_ra>
